<compile_context>
chip_gen: v6e
topology: v6e:2x2x1
jax: 0.10.0
libtpu: 0.0.40
codegen_flags: <defaults>
</compile_context>

<pallas_src>
import math
from functools import partial

import jax
import jax.numpy as jnp
from jax.experimental import pallas as pl
from jax.experimental.pallas import tpu as pltpu


def _head_kernel(x_ref, wd_ref, bd_ref, wo_ref, bo_ref, o_ref, *,
                 mxu_dtype, approx_gelu):
    # x_ref:  [TB, H]  CLS-token features tile (native dtype)
    # wd_ref: [H, H]   dense weight (in, out), resident across B-tiles
    # bd_ref: [1, H]   dense bias (f32, pre-cast in wrapper)
    # wo_ref: [1, H]   out_proj weight row (f32, pre-cast in wrapper)
    # bo_ref: (1,)     out_proj bias, SMEM scalar (f32)
    # o_ref:  [TB, 1]  logits tile
    x = x_ref[...]
    if mxu_dtype is not None:
        x = x.astype(mxu_dtype)

    # dropout(x) -> identity in eval mode.
    # MXU matmul (native or bf16 operands), f32 accumulation.
    h = jnp.dot(x, wd_ref[...], preferred_element_type=jnp.float32)
    h = h + bd_ref[...]

    if approx_gelu:
        # tanh-approx GELU: transcendental lands on the EUP slot.
        c = math.sqrt(2.0 / math.pi)
        h = 0.5 * h * (1.0 + jnp.tanh(c * (h + 0.044715 * (h * h * h))))
    else:
        # Exact GELU (PyTorch nn.GELU() default, erf form), in f32.
        h = 0.5 * h * (1.0 + jax.lax.erf(h * (1.0 / math.sqrt(2.0))))

    # dropout(h) -> identity; out_proj (H -> 1) as VPU multiply + lane reduce.
    out = jnp.sum(h * wo_ref[...], axis=-1, keepdims=True) + bo_ref[0]
    o_ref[...] = out.astype(o_ref.dtype)


def _round_up(x, m):
    return ((x + m - 1) // m) * m


def _pick_batch_tile(B, itemsize, tb_max=512):
    """Batch tile: big enough to amortize per-step overhead, small enough that
    the grid has >=2 (target 4) steps for v7x megacore + pipeline overlap."""
    sub = {4: 8, 2: 16, 1: 32}.get(itemsize, 8)   # sublane granule per dtype
    if B <= sub:
        return B                                  # full-dim block, always legal
    if B >= 2 * tb_max:
        return tb_max
    tb = _round_up(pl.cdiv(B, 4), sub)
    return max(sub, min(tb_max, tb))


def electra_classification_head(features, w_dense, b_dense, w_out, b_out, *,
                                use_bf16_matmul=False, approx_gelu=False):
    """features: [B, S, H] -> logits [B, 1].

    w_dense: [H, H] (in, out), b_dense: [H], w_out: [H, 1] (in, out), b_out: [1].
    Weights are pre-transposed as [in, out], so the kernel computes
    y = x @ W + b (equivalent to PyTorch's x @ W_pt.T + b).
    """
    B, S, H = features.shape

    TB = _pick_batch_tile(B, features.dtype.itemsize)
    grid = (pl.cdiv(B, TB),)

    # CLS gather folded into the BlockSpec via the flattened [B, S*H] view
    # (columns 0..H-1 of each row == features[:, 0, :]).  Needs H % 128 == 0.
    if H % 128 == 0:
        x_in = features.reshape(B, S * H)
    else:
        # Fallback: materialize the slice (extra, small HBM round trip).
        x_in = features[:, 0, :]
    x_spec = pl.BlockSpec((TB, H), lambda i: (i, 0))

    # Optional bf16 MXU path when the model is served in f32.
    if use_bf16_matmul and features.dtype == jnp.float32:
        wd = w_dense.astype(jnp.bfloat16)
        mxu_dtype = jnp.bfloat16
    else:
        wd = w_dense
        mxu_dtype = None

    # Constants pre-cast to f32 once (no per-step casts in the epilogue).
    bd_f32 = b_dense.astype(jnp.float32).reshape(1, H)
    wo_f32 = w_out.astype(jnp.float32).reshape(1, H)
    bo_f32 = b_out.astype(jnp.float32).reshape(1)             # SMEM scalar

    resident = pl.Buffered(1)   # grid-invariant operands: single VMEM copy

    x_itemsize = features.dtype.itemsize
    vmem_bytes = (
        H * H * wd.dtype.itemsize            # resident dense weight (1 buffer)
        + 2 * TB * H * x_itemsize            # double-buffered x tile
        + 2 * TB * features.dtype.itemsize   # double-buffered logits tile
        + 4 * H * 4                          # f32 biases / out_proj row
    )
    vmem_limit = min(max(int(1.25 * vmem_bytes) + (2 << 20), 32 << 20), 64 << 20)

    cost = pl.CostEstimate(
        flops=2 * B * H * H + 2 * B * H,
        transcendentals=B * H,
        bytes_accessed=(H * H * wd.dtype.itemsize
                        + B * H * x_itemsize
                        + 3 * H * 4
                        + B * features.dtype.itemsize),
    )

    out = pl.pallas_call(
        partial(_head_kernel, mxu_dtype=mxu_dtype, approx_gelu=approx_gelu),
        out_shape=jax.ShapeDtypeStruct((B, 1), features.dtype),
        grid=grid,
        in_specs=[
            x_spec,                                                        # x tile
            pl.BlockSpec((H, H), lambda i: (0, 0), pipeline_mode=resident),  # dense W
            pl.BlockSpec((1, H), lambda i: (0, 0), pipeline_mode=resident),  # dense b
            pl.BlockSpec((1, H), lambda i: (0, 0), pipeline_mode=resident),  # out_proj W row
            pl.BlockSpec(memory_space=pltpu.MemorySpace.SMEM),              # out_proj b
        ],
        out_specs=pl.BlockSpec((TB, 1), lambda i: (i, 0)),
        compiler_params=pltpu.CompilerParams(
            dimension_semantics=("parallel",),
            vmem_limit_bytes=vmem_limit,
        ),
        cost_estimate=cost,
    )(x_in, wd, bd_f32, wo_f32, bo_f32)
    return out


def _reference(features, w_dense, b_dense, w_out, b_out):
    x = features[:, 0, :].astype(jnp.float32)
    h = x @ w_dense.astype(jnp.float32) + b_dense.astype(jnp.float32)
    h = 0.5 * h * (1.0 + jax.lax.erf(h / jnp.sqrt(2.0).astype(jnp.float32)))
    out = h @ w_out.reshape(-1, 1).astype(jnp.float32) + b_out.astype(jnp.float32)
    return out.astype(features.dtype)


if __name__ == "__main__":
    key = jax.random.PRNGKey(0)
    S, H = 8, 128   # seq_len, hidden_size (lane-aligned)

    k_feat, k_wd, k_bd, k_wo, k_bo = jax.random.split(key, 5)
    # Deterministic synthetic params (shapes from nn.Linear(H, H) / nn.Linear(H, 1)),
    # stored as [in, out] for the kernel.
    w_dense = jax.random.normal(k_wd, (H, H), dtype=jnp.float32) * (1.0 / math.sqrt(H))
    b_dense = jax.random.normal(k_bd, (H,), dtype=jnp.float32) * 0.01
    w_out = jax.random.normal(k_wo, (H, 1), dtype=jnp.float32) * (1.0 / math.sqrt(H))
    b_out = jax.random.normal(k_bo, (1,), dtype=jnp.float32) * 0.01

    # (a) Exact path, batch divisible by the tile (B=16 -> TB=8, 2 grid steps).
    feats16 = jax.random.normal(k_feat, (16, S, H), dtype=jnp.float32)
    logits = electra_classification_head(feats16, w_dense, b_dense, w_out, b_out)
    jax.block_until_ready(logits)
    ref = _reference(feats16, w_dense, b_dense, w_out, b_out)
    assert logits.shape == (16, 1), logits.shape
    assert jnp.allclose(logits, ref, atol=1e-4, rtol=1e-4), (logits, ref)

    # (b) Exact path, ragged batch (B=20 -> TB=8, 3 grid steps, masked tail).
    feats20 = jax.random.normal(k_feat, (20, S, H), dtype=jnp.float32)
    logits = electra_classification_head(feats20, w_dense, b_dense, w_out, b_out)
    jax.block_until_ready(logits)
    ref = _reference(feats20, w_dense, b_dense, w_out, b_out)
    assert logits.shape == (20, 1), logits.shape
    assert jnp.allclose(logits, ref, atol=1e-4, rtol=1e-4), (logits, ref)

    # (c) Fast path: bf16 MXU + tanh-approx GELU (looser tolerance).
    logits = electra_classification_head(feats16, w_dense, b_dense, w_out, b_out,
                                         use_bf16_matmul=True, approx_gelu=True)
    jax.block_until_ready(logits)
    ref = _reference(feats16, w_dense, b_dense, w_out, b_out)
    assert jnp.allclose(logits, ref, atol=5e-2, rtol=5e-2), (logits, ref)

    print("KERNEL_OK")
</pallas_src>

<mosaic_0001>
module attributes {stable_mosaic.version = 11 : i64} {
  func.func @_head_kernel(%arg0: i32, %arg1: memref<8x128xf32, #tpu.memory_space<vmem>>, %arg2: memref<128x128xf32, #tpu.memory_space<vmem>>, %arg3: memref<1x128xf32, #tpu.memory_space<vmem>>, %arg4: memref<1x128xf32, #tpu.memory_space<vmem>>, %arg5: memref<1xf32, #tpu.memory_space<smem>>, %arg6: memref<8x1xf32, #tpu.memory_space<vmem>>) attributes {dimension_semantics = [#tpu.dimension_semantics<parallel>], iteration_bounds = array<i64: 2>, scalar_prefetch = 0 : i64, scratch_operands = 0 : i64, tpu.core_type = #tpu.core_type<tc>, window_params = [{transform_indices = @transform_0, window_bounds = array<i64: 8, 128>}, {pipeline_mode = #tpu.pipeline_mode<synchronous>, transform_indices = @transform_1, window_bounds = array<i64: 128, 128>}, {pipeline_mode = #tpu.pipeline_mode<synchronous>, transform_indices = @transform_2, window_bounds = array<i64: 1, 128>}, {pipeline_mode = #tpu.pipeline_mode<synchronous>, transform_indices = @transform_3, window_bounds = array<i64: 1, 128>}, {transform_indices = @transform_4, window_bounds = array<i64: 1>}, {transform_indices = @transform_5, window_bounds = array<i64: 8, 1>}]} {
    %c0 = arith.constant 0 : index
    %c0_0 = arith.constant 0 : index
    %0 = vector.load %arg1[%c0, %c0_0] : memref<8x128xf32, #tpu.memory_space<vmem>>, vector<8x128xf32>
    %c0_1 = arith.constant 0 : index
    %c0_2 = arith.constant 0 : index
    %1 = vector.load %arg2[%c0_1, %c0_2] : memref<128x128xf32, #tpu.memory_space<vmem>>, vector<128x128xf32>
    %cst = arith.constant dense<0.000000e+00> : vector<8x128xf32>
    %2 = tpu.matmul %0, %1, %cst {dimension_numbers = #tpu.dot_dimension_numbers<[1], [0], [0], [1], [0, 0, 1, 1], [], []>} : vector<8x128xf32>, vector<128x128xf32>, vector<8x128xf32> -> vector<8x128xf32>
    %c0_3 = arith.constant 0 : index
    %c0_4 = arith.constant 0 : index
    %3 = vector.load %arg3[%c0_3, %c0_4] : memref<1x128xf32, #tpu.memory_space<vmem>>, vector<1x128xf32>
    %4 = vector.broadcast %3 : vector<1x128xf32> to vector<8x128xf32>
    %5 = arith.addf %2, %4 : vector<8x128xf32>
    %cst_5 = arith.constant 5.000000e-01 : f32
    %6 = vector.broadcast %cst_5 : f32 to vector<8x128xf32>
    %7 = arith.mulf %6, %5 : vector<8x128xf32>
    %cst_6 = arith.constant 0.707106769 : f32
    %8 = vector.broadcast %cst_6 : f32 to vector<8x128xf32>
    %9 = arith.mulf %5, %8 : vector<8x128xf32>
    %10 = math.erf %9 : vector<8x128xf32>
    %cst_7 = arith.constant 1.000000e+00 : f32
    %11 = vector.broadcast %cst_7 : f32 to vector<8x128xf32>
    %12 = arith.addf %11, %10 : vector<8x128xf32>
    %13 = arith.mulf %7, %12 : vector<8x128xf32>
    %c0_8 = arith.constant 0 : index
    %c0_9 = arith.constant 0 : index
    %14 = vector.load %arg4[%c0_8, %c0_9] : memref<1x128xf32, #tpu.memory_space<vmem>>, vector<1x128xf32>
    %15 = vector.broadcast %14 : vector<1x128xf32> to vector<8x128xf32>
    %16 = arith.mulf %13, %15 : vector<8x128xf32>
    %cst_10 = arith.constant dense<0.000000e+00> : vector<8xf32>
    %17 = vector.multi_reduction <add>, %16, %cst_10 [1] : vector<8x128xf32> to vector<8xf32>
    %18 = vector.shape_cast %17 : vector<8xf32> to vector<8x1xf32>
    %c0_11 = arith.constant 0 : index
    %19 = memref.load %arg5[%c0_11] : memref<1xf32, #tpu.memory_space<smem>>
    %20 = vector.broadcast %19 : f32 to vector<8x1xf32>
    %21 = arith.addf %18, %20 : vector<8x1xf32>
    %c0_12 = arith.constant 0 : index
    %c0_13 = arith.constant 0 : index
    %22 = vector.load %arg6[%c0_12, %c0_13] : memref<8x1xf32, #tpu.memory_space<vmem>>, vector<8x1xf32>
    tpu.vector_store %arg6[%c0_12, %c0_13], %21 {strides = array<i32>} : memref<8x1xf32, #tpu.memory_space<vmem>>, vector<8x1xf32>,
    return
  }
  func.func @transform_0(%arg0: i32) -> (i32, i32) {
    %c0_i32 = arith.constant 0 : i32
    %c0_i32_0 = arith.constant 0 : i32
    return %arg0, %c0_i32 : i32, i32
  }
  func.func @transform_1(%arg0: i32) -> (i32, i32) {
    %c0_i32 = arith.constant 0 : i32
    %c0_i32_0 = arith.constant 0 : i32
    %c0_i32_1 = arith.constant 0 : i32
    return %c0_i32, %c0_i32_0 : i32, i32
  }
  func.func @transform_2(%arg0: i32) -> (i32, i32) {
    %c0_i32 = arith.constant 0 : i32
    %c0_i32_0 = arith.constant 0 : i32
    %c0_i32_1 = arith.constant 0 : i32
    return %c0_i32, %c0_i32_0 : i32, i32
  }
  func.func @transform_3(%arg0: i32) -> (i32, i32) {
    %c0_i32 = arith.constant 0 : i32
    %c0_i32_0 = arith.constant 0 : i32
    %c0_i32_1 = arith.constant 0 : i32
    return %c0_i32, %c0_i32_0 : i32, i32
  }
  func.func @transform_4(%arg0: i32) -> i32 {
    %c0_i32 = arith.constant 0 : i32
    %c0_i32_0 = arith.constant 0 : i32
    return %c0_i32 : i32
  }
  func.func @transform_5(%arg0: i32) -> (i32, i32) {
    %c0_i32 = arith.constant 0 : i32
    %c0_i32_0 = arith.constant 0 : i32
    return %arg0, %c0_i32 : i32, i32
  }
}

</mosaic_0001>

<bundles_post_ra>
// kernel: tpu_custom_call.1
= control target key start
LH: loop header
LB: loop body
LE: loop exit
PB: predicated region body
PF: predicated region fallthrough
CT: control target
= control target key end

     0   :  { %s831_s0 = inlined_call_operand.hbm [shape: f32[16,1024], index: 0, kind: input, shape index: {}]   ;;  %s832_s1 = inlined_call_operand.hbm [shape: f32[128,128], index: 1, kind: input, shape index: {}]   ;;  %s833_s2 = inlined_call_operand.vmem [shape: f32[1,128], index: 2, kind: input, shape index: {}]   ;;  %s834_s3 = inlined_call_operand.vmem [shape: f32[1,128], index: 3, kind: input, shape index: {}]   ;;  %s835_s4 = inlined_call_operand.<no memory space> [shape: f32[1], index: 4, kind: input, shape index: {}]   ;;  %s836_s5 = inlined_call_operand.vmem [shape: f32[16,1], index: 5, kind: output, shape index: {}]  }
   0x1   :  { %10 = sst [smem:[#allocation2]] %s835_s4 }
   0x2   :  { %11 = vsyncpa [#allocation4], 0 }
   0x3   :  { %13 = vsyncpa [#allocation4 + $0x1], 0 }
   0x4   :  { %14 = vsyncpa [#allocation6], 0  ;;  %s703_s20 = smov 0   ;;  %s705_s21 = smov 0  }
   0x5   :  { %s707_s22 = smov 0   ;;  %s709_s23 = smov 0  }
   0x6 LB: > { %s722_s4 = sadd.s32 4294967295, %s662_s23   ;;  %p40_p0 = scmp.ne.s32.totalorder %s654_s21, %s650_s20  ;;  %s662_s23 = sphi %s709_s23, %s851_s23   ;;  %s658_s22 = sphi %s707_s22, %s850_s22   ;;  %s654_s21 = sphi %s705_s21, %s849_s21   ;;  %s650_s20 = sphi %s703_s20, %s848_s20  }
   0x7   : > { %p837_p1 = scmp.eq.s32.totalorder %s722_s4, 0  ;;  %p447_p2 = scmp.ge.s32.totalorder %s662_s23, 1 }
   0x8   : > { %p161_p3 = scmp.lt.s32.totalorder %s662_s23, 3  ;;  %s664_s26 = smov [#allocation5]  }
   0x9   : > { %p730_p4 = por %p837_p1, %p40_p0  ;;  %s173_s27 = sshll.u32 %s664_s26, 4  ;;  %s174_s27 = int_to_ptr.vmem [resolvable:$true] %s173_s27 }
   0xa   : > { %p734_p5 = pnand %p447_p2, %p161_p3  ;;  %s747_s29 = sadd.s32 1, %s662_s23  }
   0xb   : > { %s840_s24 = scalar_select %p730_p4, 1, 0 }
   0xc   : > { %s841_s25 = scalar_select %p734_p5, 1, 0 }
   0xd   : > { %p520_p6 = pneg %p734_p5  ;;  %s27_s30 = sadd.s32 1, %s658_s22 }
   0xe   : > { %s24_s6 = ssub.s32 %s662_s23, %s747_s29  ;;  %s581_s7 = scalar_lea.vmem %s174_s27, 2048 }
   0xf   : > { %p742_p7 = pnand %p520_p6, %p837_p1  ;;  %p582_p9 = scmp.ne.s32.totalorder %s174_s27, %s581_s7 }
  0x10   : > { %p589_p12 = scmp.lt.s32.totalorder %s174_s27, %s174_s27  ;;  %p590_p13 = scmp.lt.s32.totalorder %s581_s7, %s581_s7 }
  0x11   : > { %p572_p8 = pneg %p742_p7 }
  0x12   : > { %p591_p0 = por %p590_p13, %p589_p12 }
  0x13   : > { %p584_p10 = pnand %p582_p9, %p572_p8 }
  0x15   : > { %p585_p11 = pneg %p584_p10 }
  0x17   : > { %p592_p2 = pnand %p591_p0, %p585_p11 }
  0x19   : > { %595 = shalt.err (!%p592_p2)
}
  0x1a   : > { %s665_s8 = smov 128   ;;  %s666_s9 = smov 8  }
  0x1b   : > { %523 = dma.hbm_to_vmem [thread:$0]  (!%p742_p7), %s832_s1, 2048, %s174_s27, [#allocation6], %s665_s8, %s665_s8, %s666_s9  }
  0x1c   : > { %p25_p3 = scmp.eq.s32.totalorder %s24_s6, 0  ;;  %p34_p6 = scmp.ne.s32.totalorder %s658_s22, %s654_s21 }
  0x1d   : > { %p35_p8 = scmp.eq.s32.totalorder %s662_s23, 0  ;;  %p529_p9 = scmp.lt.s32.totalorder %s662_s23, 2 }
  0x1e   : > { %s764_s12 = scalar_select %p25_p3, %s658_s22, %s27_s30  }
  0x1f   : > { %p36_p10 = por %p35_p8, %p34_p6  ;;  %s196_s13 = sand.u32 1, %s658_s22  }
  0x20   : > { %s450_s14 = sshll.u32 %s196_s13, 3  ;;  %s461_s15 = sshll.u32 %s662_s23, 10 }
  0x21   : > { %s771_s18 = scalar_lea.hbm %s831_s0, %s461_s15  ;;  %s200_s19 = scalar_lea.vmem [#allocation3], %s450_s14 }
  0x22   : > { %s208_s20 = sshll.u32 %s200_s19, 4  ;;  %p773_p7 = pnand %p529_p9, %p36_p10  ;;  %s209_s20 = int_to_ptr.vmem [resolvable:$true] %s208_s20 }
  0x23   : > { %s197_s27 = scalar_lea.sflag [#allocation4], %s196_s13  ;;  %s596_s28 = scalar_lea.hbm %s771_s18, 128 }
  0x24   : > { %p597_p11 = scmp.ne.s32.totalorder %s771_s18, %s596_s28  ;;  %p598_p12 = pneg %p773_p7 }
  0x25   : > { %s601_s6 = scalar_lea.hbm %s831_s0, 2048  ;;  %p602_p2 = scmp.lt.s32.totalorder %s771_s18, %s831_s0 }
  0x26   : > { %p599_p13 = pnand %p598_p12, %p597_p11  ;;  %p603_p3 = scmp.lt.s32.totalorder %s601_s6, %s596_s28 }
  0x28   : > { %p600_p0 = pneg %p599_p13  ;;  %p604_p6 = por %p603_p3, %p602_p2 }
  0x2a   : > { %p605_p8 = pnand %p604_p6, %p600_p0 }
  0x2c   : > { %608 = shalt.err (!%p605_p8)
}
  0x2d   : > { %s609_s9 = scalar_lea.vmem %s209_s20, 128  ;;  %s667_s10 = smov [#allocation3]  }
  0x2e   : > { %p610_p9 = scmp.ne.s32.totalorder %s209_s20, %s609_s9  ;;  %s614_s11 = sshll.u32 %s667_s10, 4  ;;  %s615_s11 = int_to_ptr.vmem [resolvable:$false] %s614_s11 }
  0x2f   : > { %s616_s13 = scalar_lea.vmem %s615_s11, 256  ;;  %p617_p11 = scmp.lt.s32.totalorder %s209_s20, %s615_s11 }
  0x30   : > { %p612_p10 = pnand %p610_p9, %p598_p12  ;;  %p618_p13 = scmp.lt.s32.totalorder %s616_s13, %s609_s9 }
  0x32   : > { %p613_p1 = pneg %p612_p10  ;;  %p619_p4 = por %p618_p13, %p617_p11 }
  0x34   : > { %p620_p5 = pnand %p619_p4, %p613_p1 }
  0x36   : > { %623 = shalt.err (!%p620_p5)
}
  0x37   : > { %527 = dma.hbm_to_vmem [thread:$0]  (!%p773_p7), %s771_s18, 128, %s209_s20, %s197_s27  }
  0x38   : > { %p844_p0 = scmp.ne.s32.totalorder %s841_s25, 0 }
  0x39   : > { %s219_s14 = sand.u32 (!%p844_p0), 1, %s654_s21   ;;  %p845_p12 = scmp.ne.s32.totalorder (!%p844_p0), %s840_s24, 0 }
  0x3a   : > { %217 = sbr.rel (%p844_p0) target bundleno = 458 (0x1ca), region = 40  ;;  %s794_s15 = sshll.u32 (!%p844_p0), %s219_s14, 3 }
  0x3b   : > { %s220_s16 = scalar_lea.sflag (!%p844_p0), [#allocation4], %s219_s14  ;;  %s223_s17 = scalar_lea.vmem (!%p844_p0), [#allocation3], %s794_s15 }
  0x3f   : > { %641 = dma.done.wait (%p845_p12), %s220_s16, 128  }
  0x40   : > { %643 = vsyncadd (%p845_p12), %s220_s16, 4294967168  ;;  %p846_p1 = scmp.eq.s32.totalorder %s722_s4, 0 }
  0x42   : > { %645 = dma.done.wait (%p846_p1), [#allocation6], 2048   ;;  %p847_p4 = pmov %p846_p1 }
  0x43   : > { %v668_v0 = vmov 0.0   ;;  %vm669_vm0 = vmmov 0   ;;  %v273_v1 = vld [vmem:[#allocation5 + $0x78] sm:$0xff]  ;;  %v272_v2 = vld [vmem:[#allocation5 + $0x70] sm:$0xff]  ;;  %v271_v3 = vld [vmem:[#allocation5 + $0x68] sm:$0xff]  ;;  %p253_p5 = scmp.lt.s32.totalorder %s722_s4, 1 }
  0x44   : > { %647 = vsyncadd (%p847_p4), [#allocation6], 4294965248  ;;  %479 = vmatprep.subr.mxu0 %v668_v0  ;;  %511 = vmatprep.mubr.msk.f32.mxu0 %vm669_vm0, %v668_v0  ;;  %v270_v4 = vld [vmem:[#allocation5 + $0x60] sm:$0xff]  ;;  %v269_v5 = vld [vmem:[#allocation5 + $0x58] sm:$0xff]  ;;  %s366_s20 = sld [smem:[#allocation2]]  ;;  %vm369_vm1 = vcmask 7168  }
  0x45   : > { %480 = vmatpush3.msra.mxu0 %v273_v1  ;;  %v268_v6 = vld [vmem:[#allocation5 + $0x50] sm:$0xff]  ;;  %v267_v7 = vld [vmem:[#allocation5 + $0x48] sm:$0xff]  ;;  %v266_v8 = vld [vmem:[#allocation5 + $0x40] sm:$0xff]  ;;  %s853_s4 = smov (!%p253_p5, %s722_s4), 1 }
  0x46   : > { %481 = vmatprep.subr.mxu0 %v668_v0  ;;  %v265_v9 = vld [vmem:[#allocation5 + $0x38] sm:$0xff]  ;;  %v264_v10 = vld [vmem:[#allocation5 + $0x30] sm:$0xff]  ;;  %v263_v11 = vld [vmem:[#allocation5 + $0x28] sm:$0xff]  ;;  %s456_s26 = sshll.u32 %s853_s4, 3 }
  0x47   : > { %482 = vmatpush3.msra.mxu0 %v272_v2  ;;  %v262_v12 = vld [vmem:[#allocation5 + $0x20] sm:$0xff]  ;;  %v261_v13 = vld [vmem:[#allocation5 + $0x18] sm:$0xff]  ;;  %v260_v14 = vld [vmem:[#allocation5 + $0x10] sm:$0xff]  ;;  %s256_s23 = scalar_lea.vmem %s836_s5, %s456_s26 }
  0x48   : > { %483 = vmatprep.subr.mxu0 %v668_v0  ;;  %v259_v15 = vld [vmem:[#allocation5 + $0x8] sm:$0xff]  ;;  %v258_v16 = vld [vmem:[#allocation5] sm:$0xff]  ;;  %v257_v17 = vld [vmem:[%s223_s17] sm:$0xff] }
  0x49   : > { %484 = vmatpush3.msra.mxu0 %v271_v3  ;;  %v457_v18 = vld [vmem:[%s833_s2] ss:$0 sm:$0xff] }
  0x4a   : > { %485 = vmatprep.subr.mxu0 %v668_v0  ;;  %v458_v26 = vld [vmem:[%s834_s3] ss:$0 sm:$0xff]  ;;  %v367_v29 = vstv %s366_s20 }
  0x4b   : > { %486 = vmatpush3.msra.mxu0 %v270_v4 }
  0x4c   : > { %487 = vmatprep.subr.mxu0 %v668_v0 }
  0x4d   : > { %488 = vmatpush3.msra.mxu0 %v269_v5 }
  0x4e   : > { %489 = vmatprep.subr.mxu0 %v668_v0 }
  0x4f   : > { %490 = vmatpush3.msra.mxu0 %v268_v6 }
  0x50   : > { %491 = vmatprep.subr.mxu0 %v668_v0 }
  0x51   : > { %492 = vmatpush3.msra.mxu0 %v267_v7 }
  0x52   : > { %493 = vmatprep.subr.mxu0 %v668_v0 }
  0x53   : > { %494 = vmatpush3.msra.mxu0 %v266_v8 }
  0x54   : > { %495 = vmatprep.subr.mxu0 %v668_v0 }
  0x55   : > { %496 = vmatpush3.msra.mxu0 %v265_v9 }
  0x56   : > { %497 = vmatprep.subr.mxu0 %v668_v0 }
  0x57   : > { %498 = vmatpush3.msra.mxu0 %v264_v10 }
  0x58   : > { %499 = vmatprep.subr.mxu0 %v668_v0 }
  0x59   : > { %500 = vmatpush3.msra.mxu0 %v263_v11 }
  0x5a   : > { %501 = vmatprep.subr.mxu0 %v668_v0 }
  0x5b   : > { %502 = vmatpush3.msra.mxu0 %v262_v12 }
  0x5c   : > { %503 = vmatprep.subr.mxu0 %v668_v0 }
  0x5d   : > { %504 = vmatpush3.msra.mxu0 %v261_v13 }
  0x5e   : > { %505 = vmatprep.subr.mxu0 %v668_v0 }
  0x5f   : > { %506 = vmatpush3.msra.mxu0 %v260_v14 }
  0x60   : > { %507 = vmatprep.subr.mxu0 %v668_v0 }
  0x61   : > { %508 = vmatpush3.msra.mxu0 %v259_v15 }
  0x62   : > { %509 = vmatprep.subr.mxu0 %v668_v0 }
  0x63   : > { %510 = vmatpush3.msra.mxu0 %v258_v16 }
  0x64   : > { %512 = vmatmul.mubr.f32.vlgmr.msra.gmra.mxu0 %v257_v17 }
 0x124   : > { %v347_v19 = vpop.f32.mrf.mxu0 }
 0x125   : > { %v348_v20 = vadd.f32 %v457_v18, %v347_v19 }
 0x126   : > { %v513_v21 = vpop.f32.mrf.mxu0 }
 0x127   : > { %v352_v22 = vmul.f32 0.70710677, %v348_v20  ;;  %v351_v24 = vmul.f32 0.5, %v348_v20 }
 0x129   : > { %568 = verf.f32 %v352_v22 }
 0x136   : > { %v569_v23 = vpop.eup %568 }
 0x137   : > { %v354_v25 = vadd.f32 1.0, %v569_v23 }
 0x139   : > { %v355_v27 = vmul.f32 %v354_v25, %v351_v24 }
 0x13b   : > { %v363_v28 = vmul.f32 %v458_v26, %v355_v27 }
 0x13d   : > { %364 = vadd.xlane.f32.xlu0 %v363_v28 }
 0x1c6   : > { %v365_v30 = vpop.xlane.xlu0 %364 }
 0x1c7   : > { %v368_v31 = vadd.f32 %v367_v29, %v365_v30 }
 0x1c9   : > { %370 = vst.msk [vmem:[%s256_s23] sm:$0xff] %vm369_vm1, %v368_v31 }
 0x1ca PF: > { %p17_p7 = scmp.ge.s32.totalorder %s747_s29, 4   ;;  %s848_s20 = smov %s654_s21 }
 0x1cb   : > { %s849_s21 = smov %s658_s22  ;;  %s850_s22 = smov %s764_s12 }
 0x1cc   : > { %s851_s23 = smov %s747_s29  ;;  %19 = sbr.rel (!%p17_p7) target bundleno = 6 (0x6), region = 84 }
 0x1d1   :  { %390 = vsyncpa [#allocation4], 1 }
 0x1d2   :  { %392 = vsyncpa [#allocation4 + $0x1], 1 }
 0x1d3   :  { %393 = vsyncpa [#allocation6], 1 }

</bundles_post_ra>
